<compile_context>
chip_gen: v7x
topology: tpu7x:2x2x1
jax: 0.10.0
libtpu: 0.0.40
codegen_flags: <defaults>
</compile_context>

<pallas_src>
import functools
import math

import jax
import jax.numpy as jnp
from jax.experimental import pallas as pl
from jax.experimental.pallas import tpu as pltpu


def _gcn_kernel(adj_ref, x_ref, w_ref, o_ref, acc_ref, *, compute_dtype):
    """acc += adj[i,k] @ (x[k] @ W); relu + store at the last k step."""
    k = pl.program_id(1)

    @pl.when(k == 0)
    def _():
        acc_ref[...] = jnp.zeros_like(acc_ref)

    # s_tile = x[k] @ W  (bf16 operands, f32 MXU accumulation), recomputed per
    # row tile -- cheap relative to streaming the N^2 adjacency.
    s = jnp.dot(x_ref[...], w_ref[...], preferred_element_type=jnp.float32)

    # Cast the adjacency tile in-kernel (adj stays f32 in HBM) and accumulate
    # the aggregate matmul in f32.
    acc_ref[...] += jnp.dot(
        adj_ref[...].astype(compute_dtype),
        s.astype(compute_dtype),
        preferred_element_type=jnp.float32,
    )

    @pl.when(k == pl.num_programs(1) - 1)
    def _():
        o_ref[...] = jnp.maximum(acc_ref[...], 0.0).astype(o_ref.dtype)


def _round_up(v, m):
    return (v + m - 1) // m * m


@functools.partial(jax.jit, static_argnames=("tm", "tk", "compute_dtype"))
def graph_convolution(x, weight, adj, *, tm=256, tk=512, compute_dtype=jnp.bfloat16):
    """Pallas GCN layer: relu(adj @ (x @ weight)), fused + k-tiled."""
    n, f_in = x.shape
    f_in_w, f_out = weight.shape
    assert f_in == f_in_w, (f_in, f_in_w)
    assert adj.shape == (n, n), adj.shape
    assert tm % 128 == 0 and tk % 128 == 0, "tiles must be multiples of 128"
    out_dtype = x.dtype

    # Lane-dense padding for feature dims; clamp tiles for small graphs so the
    # tiny case collapses to a single grid step.
    n_p128 = _round_up(n, 128)
    tm = min(tm, n_p128)
    tk = min(tk, n_p128)
    n_p = _round_up(n, math.lcm(tm, tk))
    f_in_p = _round_up(f_in, 128)
    f_out_p = _round_up(f_out, 128)

    x_p = jnp.pad(x, ((0, n_p - n), (0, f_in_p - f_in))).astype(compute_dtype)
    w_p = jnp.pad(
        weight, ((0, f_in_p - f_in), (0, f_out_p - f_out))
    ).astype(compute_dtype)
    # adj: pad only if needed (no dtype round trip); bf16 cast happens in-kernel.
    adj_p = adj if n_p == n else jnp.pad(adj, ((0, n_p - n), (0, n_p - n)))

    grid = (n_p // tm, n_p // tk)

    # Explicit VMEM ceiling sized to the buffer plan (double-buffered in/out
    # tiles + f32 accumulator scratch) with 2x headroom.
    adj_item = jnp.dtype(adj_p.dtype).itemsize
    cd_item = jnp.dtype(compute_dtype).itemsize
    out_item = jnp.dtype(out_dtype).itemsize
    vmem_plan = (
        2 * tm * tk * adj_item           # adj tiles
        + 2 * tk * f_in_p * cd_item      # x tiles
        + 2 * f_in_p * f_out_p * cd_item # weight (revisited / resident)
        + 2 * tm * f_out_p * out_item    # output tiles
        + tm * f_out_p * 4               # accumulator scratch
    )
    vmem_limit = int(min(64 * 1024 * 1024, max(2 * vmem_plan, 4 * 1024 * 1024)))

    kernel = functools.partial(_gcn_kernel, compute_dtype=compute_dtype)

    out_p = pl.pallas_call(
        kernel,
        out_shape=jax.ShapeDtypeStruct((n_p, f_out_p), out_dtype),
        grid=grid,
        in_specs=[
            pl.BlockSpec((tm, tk), lambda i, k: (i, k)),            # adj tile
            pl.BlockSpec((tk, f_in_p), lambda i, k: (k, 0)),        # x tile
            pl.BlockSpec((f_in_p, f_out_p), lambda i, k: (0, 0)),   # weight
        ],
        out_specs=pl.BlockSpec((tm, f_out_p), lambda i, k: (i, 0)),
        scratch_shapes=[pltpu.VMEM((tm, f_out_p), jnp.float32)],
        compiler_params=pltpu.CompilerParams(
            dimension_semantics=("parallel", "arbitrary"),
            vmem_limit_bytes=vmem_limit,
        ),
    )(adj_p, x_p, w_p)

    return out_p[:n, :f_out]


def xavier_uniform(key, shape, dtype=jnp.float32):
    """Deterministic re-implementation of torch.nn.init.xavier_uniform_."""
    fan_in, fan_out = shape
    bound = math.sqrt(6.0 / (fan_in + fan_out))
    return jax.random.uniform(key, shape, dtype=dtype, minval=-bound, maxval=bound)


if __name__ == "__main__":
    # Small, module-consistent shapes: N nodes, in_features, out_features.
    N, IN_FEATURES, OUT_FEATURES = 64, 32, 16
    DROPOUT = 0.5  # identity in eval mode
    # TODO(synk): training-mode dropout (F.dropout with self.training=True) is
    # not applied here; this implements the deterministic inference path.

    key = jax.random.PRNGKey(0)
    k_x, k_adj, k_w = jax.random.split(key, 3)

    x = jax.random.normal(k_x, (N, IN_FEATURES), dtype=jnp.float32)

    # Symmetric, row-normalized dense adjacency, deterministic.
    a = jax.random.uniform(k_adj, (N, N), dtype=jnp.float32)
    a = (a > 0.8).astype(jnp.float32)
    a = a + a.T + jnp.eye(N, dtype=jnp.float32)
    deg = jnp.sum(a, axis=1, keepdims=True)
    adj = a / deg

    weight = xavier_uniform(k_w, (IN_FEATURES, OUT_FEATURES))

    out = graph_convolution(x, weight, adj)
    out = jax.block_until_ready(out)
    assert out.shape == (N, OUT_FEATURES)

    hi = jax.lax.Precision.HIGHEST

    # Reference with the same bf16 quantization the kernel uses (f32 accum):
    # should match the kernel tightly.
    xb = x.astype(jnp.bfloat16).astype(jnp.float32)
    wb = weight.astype(jnp.bfloat16).astype(jnp.float32)
    ab = adj.astype(jnp.bfloat16).astype(jnp.float32)
    sb = jnp.dot(xb, wb, precision=hi).astype(jnp.bfloat16).astype(jnp.float32)
    ref_q = jnp.maximum(jnp.dot(ab, sb, precision=hi), 0.0)
    assert jnp.allclose(out, ref_q, atol=2e-3, rtol=2e-3)

    # Looser check against pure-f32 math (budget for bf16 quantization error).
    ref = jnp.maximum(
        jnp.dot(adj, jnp.dot(x, weight, precision=hi), precision=hi), 0.0
    )
    assert jnp.allclose(out, ref, atol=5e-2, rtol=5e-2)

    print("KERNEL_OK")
</pallas_src>

<mosaic_0001>
module attributes {stable_mosaic.version = 11 : i64} {
  func.func @_gcn_kernel(%arg0: i32, %arg1: i32, %arg2: memref<128x128xf32, #tpu.memory_space<vmem>>, %arg3: memref<128x128xbf16, #tpu.memory_space<vmem>>, %arg4: memref<128x128xbf16, #tpu.memory_space<vmem>>, %arg5: memref<128x128xf32, #tpu.memory_space<vmem>>, %arg6: memref<128x128xf32, #tpu.memory_space<vmem>>) attributes {dimension_semantics = [#tpu.dimension_semantics<parallel>, #tpu.dimension_semantics<arbitrary>], iteration_bounds = array<i64: 1, 1>, scalar_prefetch = 0 : i64, scratch_operands = 1 : i64, tpu.core_type = #tpu.core_type<tc>, window_params = [{transform_indices = @transform_0, window_bounds = array<i64: 128, 128>}, {transform_indices = @transform_1, window_bounds = array<i64: 128, 128>}, {pipeline_mode = #tpu.pipeline_mode<synchronous>, transform_indices = @transform_2, window_bounds = array<i64: 128, 128>}, {transform_indices = @transform_3, window_bounds = array<i64: 128, 128>}]} {
    %c0_i32 = arith.constant 0 : i32
    %0 = arith.cmpi eq, %arg1, %c0_i32 : i32
    %1 = arith.extui %0 : i1 to i32
    %c0_i32_0 = arith.constant 0 : i32
    %2 = arith.cmpi ne, %1, %c0_i32_0 : i32
    scf.if %2 {
      %cst_13 = arith.constant 0.000000e+00 : f32
      %16 = vector.broadcast %cst_13 : f32 to vector<128x128xf32>
      %c0_14 = arith.constant 0 : index
      %c0_15 = arith.constant 0 : index
      %17 = vector.load %arg6[%c0_14, %c0_15] : memref<128x128xf32, #tpu.memory_space<vmem>>, vector<128x128xf32>
      tpu.vector_store %arg6[%c0_14, %c0_15], %16 {strides = array<i32>} : memref<128x128xf32, #tpu.memory_space<vmem>>, vector<128x128xf32>,
    } else {
    }
    %c0 = arith.constant 0 : index
    %c0_1 = arith.constant 0 : index
    %3 = vector.load %arg3[%c0, %c0_1] : memref<128x128xbf16, #tpu.memory_space<vmem>>, vector<128x128xbf16>
    %c0_2 = arith.constant 0 : index
    %c0_3 = arith.constant 0 : index
    %4 = vector.load %arg4[%c0_2, %c0_3] : memref<128x128xbf16, #tpu.memory_space<vmem>>, vector<128x128xbf16>
    %cst = arith.constant dense<0.000000e+00> : vector<128x128xf32>
    %5 = tpu.matmul %3, %4, %cst {dimension_numbers = #tpu.dot_dimension_numbers<[1], [0], [0], [1], [0, 0, 1, 1], [], []>} : vector<128x128xbf16>, vector<128x128xbf16>, vector<128x128xf32> -> vector<128x128xf32>
    %c0_4 = arith.constant 0 : index
    %c0_5 = arith.constant 0 : index
    %6 = vector.load %arg6[%c0_4, %c0_5] : memref<128x128xf32, #tpu.memory_space<vmem>>, vector<128x128xf32>
    %c0_6 = arith.constant 0 : index
    %c0_7 = arith.constant 0 : index
    %7 = vector.load %arg2[%c0_6, %c0_7] : memref<128x128xf32, #tpu.memory_space<vmem>>, vector<128x128xf32>
    %8 = arith.truncf %7 : vector<128x128xf32> to vector<128x128xbf16>
    %9 = arith.truncf %5 : vector<128x128xf32> to vector<128x128xbf16>
    %cst_8 = arith.constant dense<0.000000e+00> : vector<128x128xf32>
    %10 = tpu.matmul %8, %9, %cst_8 {dimension_numbers = #tpu.dot_dimension_numbers<[1], [0], [0], [1], [0, 0, 1, 1], [], []>} : vector<128x128xbf16>, vector<128x128xbf16>, vector<128x128xf32> -> vector<128x128xf32>
    %11 = arith.addf %6, %10 : vector<128x128xf32>
    %c0_9 = arith.constant 0 : index
    %c0_10 = arith.constant 0 : index
    %12 = vector.load %arg6[%c0_9, %c0_10] : memref<128x128xf32, #tpu.memory_space<vmem>>, vector<128x128xf32>
    tpu.vector_store %arg6[%c0_9, %c0_10], %11 {strides = array<i32>} : memref<128x128xf32, #tpu.memory_space<vmem>>, vector<128x128xf32>,
    %c0_i32_11 = arith.constant 0 : i32
    %13 = arith.cmpi eq, %arg1, %c0_i32_11 : i32
    %14 = arith.extui %13 : i1 to i32
    %c0_i32_12 = arith.constant 0 : i32
    %15 = arith.cmpi ne, %14, %c0_i32_12 : i32
    scf.if %15 {
      %c0_13 = arith.constant 0 : index
      %c0_14 = arith.constant 0 : index
      %16 = vector.load %arg6[%c0_13, %c0_14] : memref<128x128xf32, #tpu.memory_space<vmem>>, vector<128x128xf32>
      %cst_15 = arith.constant 0.000000e+00 : f32
      %17 = vector.broadcast %cst_15 : f32 to vector<128x128xf32>
      %18 = arith.maximumf %16, %17 : vector<128x128xf32>
      %c0_16 = arith.constant 0 : index
      %c0_17 = arith.constant 0 : index
      %19 = vector.load %arg5[%c0_16, %c0_17] : memref<128x128xf32, #tpu.memory_space<vmem>>, vector<128x128xf32>
      tpu.vector_store %arg5[%c0_16, %c0_17], %18 {strides = array<i32>} : memref<128x128xf32, #tpu.memory_space<vmem>>, vector<128x128xf32>,
    } else {
    }
    return
  }
  func.func @transform_0(%arg0: i32, %arg1: i32) -> (i32, i32) {
    %c0_i32 = arith.constant 0 : i32
    return %arg0, %arg1 : i32, i32
  }
  func.func @transform_1(%arg0: i32, %arg1: i32) -> (i32, i32) {
    %c0_i32 = arith.constant 0 : i32
    %c0_i32_0 = arith.constant 0 : i32
    return %arg1, %c0_i32 : i32, i32
  }
  func.func @transform_2(%arg0: i32, %arg1: i32) -> (i32, i32) {
    %c0_i32 = arith.constant 0 : i32
    %c0_i32_0 = arith.constant 0 : i32
    %c0_i32_1 = arith.constant 0 : i32
    return %c0_i32, %c0_i32_0 : i32, i32
  }
  func.func @transform_3(%arg0: i32, %arg1: i32) -> (i32, i32) {
    %c0_i32 = arith.constant 0 : i32
    %c0_i32_0 = arith.constant 0 : i32
    return %arg0, %c0_i32 : i32, i32
  }
}

</mosaic_0001>

<bundles_post_ra>
// kernel: graph_convolution.1
= control target key start
LH: loop header
LB: loop body
LE: loop exit
PB: predicated region body
PF: predicated region fallthrough
CT: control target
= control target key end

     0   :  { %s784_s2 = inlined_call_operand.vmem [shape: bf16[128,128], index: 2, kind: input, shape index: {}]   ;;  %s785_s1 = inlined_call_operand.vmem [shape: bf16[128,128], index: 1, kind: input, shape index: {}]   ;;  %s786_s0 = inlined_call_operand.vmem [shape: f32[128,128], index: 0, kind: input, shape index: {}]   ;;  %s787_s3 = inlined_call_operand.vmem [shape: f32[128,128], index: 3, kind: output, shape index: {}]  }
   0x1   :  { %v604_v0 = vld [vmem:[%s784_s2] sm:$0xff]   ;;  %v605_v1 = vld [vmem:[%s784_s2 + $0x8] sm:$0xff]   ;;  %v606_v2 = vld [vmem:[%s784_s2 + $0x10] sm:$0xff]  }
   0x2   :  { %540 = vmatprep.subr.bf16.mxu0 %v604_v0  ;;  %v607_v3 = vld [vmem:[%s784_s2 + $0x18] sm:$0xff]   ;;  %v612_v4 = vld [vmem:[%s785_s1] sm:$0xff]   ;;  %v609_v6 = vld [vmem:[%s784_s2 + $0x28] sm:$0xff]  }
   0x3   :  { %541 = vmatpush3.bf16.msra.mxu0 %v604_v0  ;;  %556 = vmatprep.mubr.bf16.mxu0 %v612_v4  ;;  %v608_v5 = vld [vmem:[%s784_s2 + $0x20] sm:$0xff]   ;;  %v610_v7 = vld [vmem:[%s784_s2 + $0x30] sm:$0xff]   ;;  %v611_v8 = vld [vmem:[%s784_s2 + $0x38] sm:$0xff]  }
   0x4   :  { %542 = vmatprep.subr.bf16.mxu0 %v605_v1  ;;  %v613_v9 = vld [vmem:[%s785_s1 + $0x8] sm:$0xff]   ;;  %v614_v10 = vld [vmem:[%s785_s1 + $0x10] sm:$0xff]   ;;  %v615_v11 = vld [vmem:[%s785_s1 + $0x18] sm:$0xff]  }
   0x5   :  { %v616_v12 = vld [vmem:[%s785_s1 + $0x20] sm:$0xff]   ;;  %v617_v13 = vld [vmem:[%s785_s1 + $0x28] sm:$0xff]   ;;  %v618_v14 = vld [vmem:[%s785_s1 + $0x30] sm:$0xff]  }
   0x6   :  { %v619_v15 = vld [vmem:[%s785_s1 + $0x38] sm:$0xff]   ;;  %v276_v16 = vld [vmem:[%s786_s0] sm:$0xff]  ;;  %v277_v17 = vld [vmem:[%s786_s0 + $0x8] sm:$0xff] }
   0x7   :  { %543 = vmatpush3.bf16.msra.mxu0 %v605_v1  ;;  %v292_v18 = vpack.c.bf16 %v277_v17, %v276_v16  ;;  %v278_v43 = vld [vmem:[%s786_s0 + $0x10] sm:$0xff]  ;;  %v279_v44 = vld [vmem:[%s786_s0 + $0x18] sm:$0xff]  ;;  %v280_v45 = vld [vmem:[%s786_s0 + $0x20] sm:$0xff] }
   0x8   :  { %544 = vmatprep.subr.bf16.mxu0 %v606_v2  ;;  %v281_v46 = vld [vmem:[%s786_s0 + $0x28] sm:$0xff]  ;;  %v293_v47 = vpack.c.bf16 %v279_v44, %v278_v43  ;;  %v282_v49 = vld [vmem:[%s786_s0 + $0x30] sm:$0xff]  ;;  %v283_v50 = vld [vmem:[%s786_s0 + $0x38] sm:$0xff] }
   0x9   :  { %588 = vmatprep.mubr.bf16.mxu1 %v292_v18  ;;  %v294_v48 = vpack.c.bf16 %v281_v46, %v280_v45  ;;  %v284_v51 = vld [vmem:[%s786_s0 + $0x40] sm:$0xff]  ;;  %v285_v52 = vld [vmem:[%s786_s0 + $0x48] sm:$0xff]  ;;  %v295_v53 = vpack.c.bf16 %v283_v50, %v282_v49  ;;  %v286_v55 = vld [vmem:[%s786_s0 + $0x50] sm:$0xff] }
   0xa   :  { %v296_v54 = vpack.c.bf16 %v285_v52, %v284_v51  ;;  %v287_v56 = vld [vmem:[%s786_s0 + $0x58] sm:$0xff]  ;;  %v288_v57 = vld [vmem:[%s786_s0 + $0x60] sm:$0xff]  ;;  %v289_v58 = vld [vmem:[%s786_s0 + $0x68] sm:$0xff] }
   0xb   :  { %545 = vmatpush3.bf16.msra.mxu0 %v606_v2  ;;  %v297_v59 = vpack.c.bf16 %v287_v56, %v286_v55  ;;  %v298_v60 = vpack.c.bf16 %v289_v58, %v288_v57  ;;  %v290_v61 = vld [vmem:[%s786_s0 + $0x70] sm:$0xff]  ;;  %v291_v62 = vld [vmem:[%s786_s0 + $0x78] sm:$0xff] }
   0xc   :  { %546 = vmatprep.subr.bf16.mxu0 %v607_v3  ;;  %v299_v63 = vpack.c.bf16 %v291_v62, %v290_v61 }
   0xf   :  { %547 = vmatpush3.bf16.msra.mxu0 %v607_v3 }
  0x10   :  { %548 = vmatprep.subr.bf16.mxu0 %v608_v5 }
  0x13   :  { %549 = vmatpush3.bf16.msra.mxu0 %v608_v5 }
  0x14   :  { %550 = vmatprep.subr.bf16.mxu0 %v609_v6 }
  0x17   :  { %551 = vmatpush3.bf16.msra.mxu0 %v609_v6 }
  0x18   :  { %552 = vmatprep.subr.bf16.mxu0 %v610_v7 }
  0x1b   :  { %553 = vmatpush3.bf16.msra.mxu0 %v610_v7 }
  0x1c   :  { %554 = vmatprep.subr.bf16.mxu0 %v611_v8 }
  0x1f   :  { %555 = vmatpush3.bf16.msra.mxu0 %v611_v8 }
  0x22   :  { %557 = vmatmul.mubr.bf16.vlgmr.msra.gmra.mrb[0].mxu0 %v613_v9 }
  0x23   :  { %560 = vmatprep.mubr.bf16.mxu0 %v614_v10 }
  0x2a   :  { %561 = vmatmul.mubr.bf16.gmra.mrb[4].mxu0 %v615_v11 }
  0x2b   :  { %564 = vmatprep.mubr.bf16.mxu0 %v616_v12 }
  0x32   :  { %565 = vmatmul.mubr.bf16.gmra.mrb[8].mxu0 %v617_v13 }
  0x33   :  { %568 = vmatprep.mubr.bf16.mxu0 %v618_v14 }
  0x3a   :  { %569 = vmatmul.mubr.bf16.gmra.mrb[12].mxu0 %v619_v15 }
  0xf5   :  { %v558_v19 = vpop.f32.mrb[0].mxu0 }
  0xf6   :  { %v197_v20 = vpop.f32.mrb[1].mxu0 }
  0xf7   :  { %v559_v21 = vpop.f32.mrb[2].mxu0 }
  0xf8   :  { %v301_v22 = vpack.c.bf16 %v559_v21, %v558_v19  ;;  %v200_v23 = vpop.f32.mrb[3].mxu0 }
  0xf9   :  { %v300_v24 = vpack.c.bf16 %v200_v23, %v197_v20 }
  0xfb   :  { %572 = vmatprep.subr.bf16.mxu1 %v300_v24 }
  0xfc   :  { %573 = vmatpush3.bf16.msra.mxu1 %v300_v24 }
  0xfd   :  { %v562_v25 = vpop.f32.mrb[4].mxu0  ;;  %574 = vmatprep.subr.bf16.mxu1 %v301_v22 }
  0xfe   :  { %v213_v26 = vpop.f32.mrb[5].mxu0 }
  0xff   :  { %v563_v27 = vpop.f32.mrb[6].mxu0 }
 0x100   :  { %v303_v28 = vpack.c.bf16 %v563_v27, %v562_v25  ;;  %v216_v29 = vpop.f32.mrb[7].mxu0  ;;  %575 = vmatpush3.bf16.msra.mxu1 %v301_v22 }
 0x101   :  { %v302_v30 = vpack.c.bf16 %v216_v29, %v213_v26 }
 0x103   :  { %576 = vmatprep.subr.bf16.mxu1 %v302_v30 }
 0x104   :  { %577 = vmatpush3.bf16.msra.mxu1 %v302_v30 }
 0x105   :  { %v566_v31 = vpop.f32.mrb[8].mxu0  ;;  %578 = vmatprep.subr.bf16.mxu1 %v303_v28 }
 0x106   :  { %v229_v32 = vpop.f32.mrb[9].mxu0 }
 0x107   :  { %v567_v33 = vpop.f32.mrb[10].mxu0 }
 0x108   :  { %v305_v34 = vpack.c.bf16 %v567_v33, %v566_v31  ;;  %v232_v35 = vpop.f32.mrb[11].mxu0  ;;  %579 = vmatpush3.bf16.msra.mxu1 %v303_v28 }
 0x109   :  { %v304_v36 = vpack.c.bf16 %v232_v35, %v229_v32 }
 0x10b   :  { %580 = vmatprep.subr.bf16.mxu1 %v304_v36 }
 0x10c   :  { %581 = vmatpush3.bf16.msra.mxu1 %v304_v36 }
 0x10d   :  { %v570_v37 = vpop.f32.mrb[12].mxu0  ;;  %582 = vmatprep.subr.bf16.mxu1 %v305_v34 }
 0x10e   :  { %v245_v38 = vpop.f32.mrb[13].mxu0 }
 0x10f   :  { %v571_v39 = vpop.f32.mrb[14].mxu0 }
 0x110   :  { %v307_v40 = vpack.c.bf16 %v571_v39, %v570_v37  ;;  %v248_v41 = vpop.f32.mrb[15].mxu0  ;;  %583 = vmatpush3.bf16.msra.mxu1 %v305_v34 }
 0x111   :  { %v306_v42 = vpack.c.bf16 %v248_v41, %v245_v38 }
 0x113   :  { %584 = vmatprep.subr.bf16.mxu1 %v306_v42 }
 0x114   :  { %585 = vmatpush3.bf16.msra.mxu1 %v306_v42 }
 0x115   :  { %586 = vmatprep.subr.bf16.mxu1 %v307_v40 }
 0x118   :  { %587 = vmatpush3.bf16.msra.mxu1 %v307_v40 }
 0x11b   :  { %589 = vmatmul.mubr.bf16.vlgmr.msra.gmra.mrb[0].mxu1 %v293_v47 }
 0x11c   :  { %592 = vmatprep.mubr.bf16.mxu1 %v294_v48 }
 0x123   :  { %593 = vmatmul.mubr.bf16.gmra.mrb[4].mxu1 %v295_v53 }
 0x124   :  { %596 = vmatprep.mubr.bf16.mxu1 %v296_v54 }
 0x12b   :  { %597 = vmatmul.mubr.bf16.gmra.mrb[8].mxu1 %v297_v59 }
 0x12c   :  { %600 = vmatprep.mubr.bf16.mxu1 %v298_v60 }
 0x133   :  { %601 = vmatmul.mubr.bf16.gmra.mrb[12].mxu1 %v299_v63 }
 0x1ee   :  { %v590_v0 = vpop.f32.mrb[0].mxu1 }
 0x1ef   :  { %v458_v1 = vmax.f32 %v590_v0, 0.0  ;;  %v342_v2 = vpop.f32.mrb[1].mxu1 }
 0x1f0   :  { %v456_v3 = vmax.f32 %v342_v2, 0.0  ;;  %v591_v4 = vpop.f32.mrb[2].mxu1 }
 0x1f1   :  { %474 = vst [vmem:[%s787_s3 + $0x10] sm:$0xff] %v458_v1  ;;  %v459_v5 = vmax.f32 %v591_v4, 0.0  ;;  %v345_v6 = vpop.f32.mrb[3].mxu1 }
 0x1f2   :  { %472 = vst [vmem:[%s787_s3] sm:$0xff] %v456_v3  ;;  %v457_v7 = vmax.f32 %v345_v6, 0.0 }
 0x1f3   :  { %475 = vst [vmem:[%s787_s3 + $0x18] sm:$0xff] %v459_v5 }
 0x1f4   :  { %473 = vst [vmem:[%s787_s3 + $0x8] sm:$0xff] %v457_v7 }
 0x1f6   :  { %v594_v8 = vpop.f32.mrb[4].mxu1 }
 0x1f7   :  { %v462_v9 = vmax.f32 %v594_v8, 0.0  ;;  %v358_v10 = vpop.f32.mrb[5].mxu1 }
 0x1f8   :  { %v460_v11 = vmax.f32 %v358_v10, 0.0  ;;  %v595_v12 = vpop.f32.mrb[6].mxu1 }
 0x1f9   :  { %478 = vst [vmem:[%s787_s3 + $0x30] sm:$0xff] %v462_v9  ;;  %v463_v13 = vmax.f32 %v595_v12, 0.0  ;;  %v361_v14 = vpop.f32.mrb[7].mxu1 }
 0x1fa   :  { %476 = vst [vmem:[%s787_s3 + $0x20] sm:$0xff] %v460_v11  ;;  %v461_v15 = vmax.f32 %v361_v14, 0.0 }
 0x1fb   :  { %479 = vst [vmem:[%s787_s3 + $0x38] sm:$0xff] %v463_v13 }
 0x1fc   :  { %477 = vst [vmem:[%s787_s3 + $0x28] sm:$0xff] %v461_v15 }
 0x1fe   :  { %v598_v16 = vpop.f32.mrb[8].mxu1 }
 0x1ff   :  { %v466_v17 = vmax.f32 %v598_v16, 0.0  ;;  %v374_v18 = vpop.f32.mrb[9].mxu1 }
 0x200   :  { %v464_v19 = vmax.f32 %v374_v18, 0.0  ;;  %v599_v20 = vpop.f32.mrb[10].mxu1 }
 0x201   :  { %482 = vst [vmem:[%s787_s3 + $0x50] sm:$0xff] %v466_v17  ;;  %v467_v21 = vmax.f32 %v599_v20, 0.0  ;;  %v377_v22 = vpop.f32.mrb[11].mxu1 }
 0x202   :  { %480 = vst [vmem:[%s787_s3 + $0x40] sm:$0xff] %v464_v19  ;;  %v465_v23 = vmax.f32 %v377_v22, 0.0 }
 0x203   :  { %483 = vst [vmem:[%s787_s3 + $0x58] sm:$0xff] %v467_v21 }
 0x204   :  { %481 = vst [vmem:[%s787_s3 + $0x48] sm:$0xff] %v465_v23 }
 0x206   :  { %v602_v24 = vpop.f32.mrb[12].mxu1 }
 0x207   :  { %v470_v25 = vmax.f32 %v602_v24, 0.0  ;;  %v390_v26 = vpop.f32.mrb[13].mxu1 }
 0x208   :  { %v468_v27 = vmax.f32 %v390_v26, 0.0  ;;  %v603_v28 = vpop.f32.mrb[14].mxu1 }
 0x209   :  { %486 = vst [vmem:[%s787_s3 + $0x70] sm:$0xff] %v470_v25  ;;  %v471_v29 = vmax.f32 %v603_v28, 0.0  ;;  %v393_v30 = vpop.f32.mrb[15].mxu1 }
 0x20a   :  { %484 = vst [vmem:[%s787_s3 + $0x60] sm:$0xff] %v468_v27  ;;  %v469_v31 = vmax.f32 %v393_v30, 0.0 }
 0x20b   :  { %487 = vst [vmem:[%s787_s3 + $0x78] sm:$0xff] %v471_v29 }
 0x20c   :  { %485 = vst [vmem:[%s787_s3 + $0x68] sm:$0xff] %v469_v31 }

</bundles_post_ra>
